<compile_context>
chip_gen: v7x
topology: tpu7x:2x2x1
jax: 0.10.0
libtpu: 0.0.40
codegen_flags: <defaults>
</compile_context>

<pallas_src>
import math

import jax
import jax.numpy as jnp
from jax.experimental import pallas as pl
from jax.experimental.pallas import tpu as pltpu


# ----------------------------------------------------------------------------
# helpers
# ----------------------------------------------------------------------------
def _round_up(x: int, m: int) -> int:
    return ((x + m - 1) // m) * m


def _round_down(x: int, m: int) -> int:
    return (x // m) * m


def _choose_tile(dim: int, preferred: int, granule: int) -> int:
    """Largest multiple-of-`granule` tile <= preferred that divides `dim`.

    Falls back to the full dim (block_shape == array dim is always legal for
    the (8,128) BlockSpec rule) — never returns a misaligned partial tile.
    """
    if dim <= preferred:
        return dim
    t = _round_down(min(preferred, dim), granule)
    while t >= granule:
        if dim % t == 0:
            return t
        t -= granule
    return dim


def _next_smaller_tile(dim: int, cur: int, granule: int) -> int:
    cand = _choose_tile(dim, max(granule, cur // 2), granule)
    return cand if cand < cur else cur


def _tpu_hints():
    """(vmem_capacity_bytes, tensorcores_per_chip) with conservative fallbacks."""
    cap = 64 * 1024 * 1024          # conservative: v7x per-TensorCore VMEM
    cores = 1
    try:
        info = pltpu.get_tpu_info()
        cap = int(getattr(info, "vmem_capacity_bytes", cap))
        for name in ("num_tensorcores", "tensorcores_per_chip", "num_cores"):
            v = getattr(info, name, None)
            if v:
                cores = int(v)
                break
    except Exception:
        pass
    return cap, cores


# ----------------------------------------------------------------------------
# one-time (load-time) weight preparation
# ----------------------------------------------------------------------------
def prepare_llama_mlp_weights(gate_w, up_w, down_w, *, param_dtype=None):
    """Re-lay weights once at load time (NOT per forward call).

    PyTorch nn.Linear layout in:  gate_w/up_w: [I, H], down_w: [H, I].
    Returns contraction-dim-first layouts: gate_wt/up_wt: [H, I], down_wt: [I, H]
    so every matmul inside the kernel contracts lhs-last with rhs-first
    (no in-kernel transposes, no per-call HBM re-layout traffic).

    Optionally casts weights (e.g. to bf16 for the v6e/v7x MXU fast path);
    accumulation inside the kernel stays f32.
    """
    if param_dtype is not None:
        gate_w = gate_w.astype(param_dtype)
        up_w = up_w.astype(param_dtype)
        down_w = down_w.astype(param_dtype)
    return gate_w.T, up_w.T, down_w.T   # (H, I), (H, I), (I, H)


# ----------------------------------------------------------------------------
# kernel
# ----------------------------------------------------------------------------
def _make_mlp_kernel(use_scratch: bool, act_dtype):
    """Kernel: per (token-tile m, intermediate-tile j) grid step."""
    act_dtype = jnp.dtype(act_dtype)

    def _step(x_ref, gw_ref, uw_ref, dw_ref, acc_ref):
        @pl.when(pl.program_id(1) == 0)
        def _():
            acc_ref[...] = jnp.zeros_like(acc_ref)

        x = x_ref[...]                              # (TM, H)
        if x.dtype != gw_ref.dtype:                 # bf16 weight fast path
            x = x.astype(gw_ref.dtype)

        # Standard ((1,),(0,)) matmuls — weights are contraction-dim-first,
        # so Mosaic needs no XLU transpose per step.
        gate = jnp.dot(x, gw_ref[...], preferred_element_type=jnp.float32)
        up = jnp.dot(x, uw_ref[...], preferred_element_type=jnp.float32)

        if act_dtype != jnp.dtype(jnp.float32):
            # bf16 VPU/EUP on v6e/v7x: halves elementwise + vld/vst traffic
            # for the (TM, TI) intermediate; accumulation stays f32.
            gate = gate.astype(act_dtype)
            up = up.astype(act_dtype)

        h = (gate * jax.nn.sigmoid(gate) * up).astype(dw_ref.dtype)   # SiLU(g)*u
        acc_ref[...] += jnp.dot(h, dw_ref[...],
                                preferred_element_type=jnp.float32)

    if use_scratch:
        def kernel(x_ref, gw_ref, uw_ref, dw_ref, o_ref, acc_ref):
            _step(x_ref, gw_ref, uw_ref, dw_ref, acc_ref)

            @pl.when(pl.program_id(1) == pl.num_programs(1) - 1)
            def _():
                o_ref[...] = acc_ref[...].astype(o_ref.dtype)
    else:
        def kernel(x_ref, gw_ref, uw_ref, dw_ref, o_ref):
            # f32 output: accumulate directly into the resident output block.
            _step(x_ref, gw_ref, uw_ref, dw_ref, o_ref)

    return kernel


# ----------------------------------------------------------------------------
# wrapper
# ----------------------------------------------------------------------------
def llama_mlp_pallas(x, prepared_weights, *, tp=1, tm_pref=None, ti_pref=None,
                     out_dtype=None, weight_buffers=None):
    """x: [..., H]; prepared_weights from prepare_llama_mlp_weights().

    `tp` is kept for interface parity with the PyTorch module; any TI-tiling
    of the intermediate dim is equivalent to the tp-shard decomposition.
    """
    gate_wt, up_wt, down_wt = prepared_weights
    *lead, H = x.shape
    I = gate_wt.shape[1]
    assert gate_wt.shape == (H, I) and up_wt.shape == (H, I)
    assert down_wt.shape == (I, H)
    assert I % tp == 0

    M = int(math.prod(lead)) if lead else 1
    x2d = x.reshape(M, H)

    out_dtype = jnp.dtype(x.dtype if out_dtype is None else out_dtype)
    bytes_x = jnp.dtype(x.dtype).itemsize
    bytes_w = jnp.dtype(gate_wt.dtype).itemsize
    bytes_o = out_dtype.itemsize

    # --- pad M up to the sublane granule (never emit a misaligned TM) -------
    m_granule = 16 if x.dtype == jnp.bfloat16 else 8
    M_pad = _round_up(max(M, m_granule), m_granule)
    if M_pad != M:
        x2d = jnp.pad(x2d, ((0, M_pad - M), (0, 0)))

    # --- generation-aware tile selection ------------------------------------
    cap, cores = _tpu_hints()
    budget = int(cap * 0.80)

    if tm_pref is None:
        # 128-MiB-VMEM chips (v5e/v6e): big TM (weight-streaming roofline);
        # 64-MiB chips (v7x): ridge ~310 FLOPs/byte, TM=512 already compute-bound.
        tm_pref = 512 if cap <= (80 << 20) else 1024
    tm_pref = max(int(tm_pref), m_granule)

    # Megacore occupancy: keep at least `cores` token tiles when possible so
    # the leading "parallel" axis actually shards across both v7x TensorCores.
    if cores >= 2 and M_pad >= cores * m_granule:
        tm_pref = min(tm_pref, max(m_granule, _round_down(M_pad // cores, m_granule)))

    if ti_pref is None:
        # Decode (single/small token tile) is weight-bandwidth bound: bigger
        # weight tiles amortize the ~0.35us/step grid overhead.
        ti_pref = 1024 if M_pad < 128 else 512
    ti_pref = max(int(ti_pref), 128)

    TM = _choose_tile(M_pad, tm_pref, m_granule)
    TI = _choose_tile(I, ti_pref, 128)

    def _vmem_need(tm, ti, wbuf):
        return (2 * tm * H * bytes_x            # x tile (double-buffered)
                + wbuf * 3 * ti * H * bytes_w   # gate + up + down weight tiles
                + 2 * tm * H * bytes_o          # output tile (double-buffered)
                + tm * H * 4                    # f32 accumulator
                + (2 << 20))                    # misc / internal scratch margin

    # Shrink TI first (weights stream once per token-tile pass either way),
    # then TM, until the working set fits the per-core VMEM budget.
    for _ in range(64):
        if _vmem_need(TM, TI, 2) <= budget:
            break
        new_ti = _next_smaller_tile(I, TI, 128)
        if new_ti < TI:
            TI = new_ti
            continue
        new_tm = _next_smaller_tile(M_pad, TM, m_granule)
        if new_tm < TM:
            TM = new_tm
            continue
        break

    n_ti = I // TI
    n_tm = M_pad // TM

    if weight_buffers is None:
        # 3-deep weight buffering hides DMA jitter at decode; only when it fits.
        n_wbuf = 3 if (n_tm == 1 and n_ti >= 3
                       and _vmem_need(TM, TI, 3) <= budget) else 2
    else:
        n_wbuf = int(weight_buffers)

    vmem_limit = int(min(int(cap * 0.90),
                         max(32 << 20, _vmem_need(TM, TI, n_wbuf) + (8 << 20))))

    use_scratch = out_dtype != jnp.dtype(jnp.float32)
    act_dtype = (jnp.bfloat16 if jnp.dtype(gate_wt.dtype) == jnp.bfloat16
                 else jnp.float32)
    kernel = _make_mlp_kernel(use_scratch, act_dtype)
    scratch_shapes = [pltpu.VMEM((TM, H), jnp.float32)] if use_scratch else []

    wspec_kwargs = {} if n_wbuf == 2 else {"pipeline_mode": pl.Buffered(n_wbuf)}

    cost = pl.CostEstimate(
        flops=6 * M_pad * I * H,
        transcendentals=M_pad * I,
        bytes_accessed=(M_pad * H * bytes_x
                        + n_tm * 3 * I * H * bytes_w
                        + M_pad * H * bytes_o),
    )

    # TODO(synk): for the toy H=32 config the output store is lane-sparse
    # (last dim < 128, masked vst); production H is a multiple of 128.
    out2d = pl.pallas_call(
        kernel,
        out_shape=jax.ShapeDtypeStruct((M_pad, H), out_dtype),
        grid_spec=pltpu.PrefetchScalarGridSpec(
            num_scalar_prefetch=0,
            grid=(n_tm, n_ti),
            in_specs=[
                # activation tile, resident across the reduction axis
                pl.BlockSpec((TM, H), lambda m, j: (m, 0)),
                # gate / up / down weight tiles (contraction-dim-first layout)
                pl.BlockSpec((H, TI), lambda m, j: (0, j), **wspec_kwargs),
                pl.BlockSpec((H, TI), lambda m, j: (0, j), **wspec_kwargs),
                pl.BlockSpec((TI, H), lambda m, j: (j, 0), **wspec_kwargs),
            ],
            out_specs=pl.BlockSpec((TM, H), lambda m, j: (m, 0)),
            scratch_shapes=scratch_shapes,
        ),
        compiler_params=pltpu.CompilerParams(
            # token tiles shard across TensorCores; reduction axis is last
            dimension_semantics=("parallel", "arbitrary"),
            vmem_limit_bytes=vmem_limit,
        ),
        cost_estimate=cost,
    )(x2d, gate_wt, up_wt, down_wt)

    if M_pad != M:
        out2d = out2d[:M]
    return out2d.reshape(*lead, H) if lead else out2d.reshape(H)


# ----------------------------------------------------------------------------
# references
# ----------------------------------------------------------------------------
def llama_mlp_ref(x, gate_w, up_w, down_w):
    """Pure-JAX f32 reference of the PyTorch forward (torch weight layout)."""
    gate = jnp.einsum("...h,ih->...i", x, gate_w)
    up = jnp.einsum("...h,ih->...i", x, up_w)
    h = gate * jax.nn.sigmoid(gate) * up
    return jnp.einsum("...i,hi->...h", h, down_w)


def llama_mlp_ref_prepared(x, prepared_weights, act_dtype=jnp.float32):
    """Precision-matched reference mimicking the kernel's dtype sequence."""
    gwt, uwt, dwt = prepared_weights
    *lead, H = x.shape
    M = int(math.prod(lead)) if lead else 1
    x2d = x.reshape(M, H)
    if x2d.dtype != gwt.dtype:
        x2d = x2d.astype(gwt.dtype)
    gate = jnp.dot(x2d, gwt, preferred_element_type=jnp.float32)
    up = jnp.dot(x2d, uwt, preferred_element_type=jnp.float32)
    gate = gate.astype(act_dtype)
    up = up.astype(act_dtype)
    h = (gate * jax.nn.sigmoid(gate) * up).astype(dwt.dtype)
    out = jnp.dot(h, dwt, preferred_element_type=jnp.float32)
    return out.reshape(*lead, H).astype(x.dtype)


# ----------------------------------------------------------------------------
# self-test
# ----------------------------------------------------------------------------
if __name__ == "__main__":
    # Small config consistent with the module:
    #   hidden_size=32, intermediate_size=256, tp=2, hidden_act='silu'
    batch, seq = 2, 8
    hidden_size = 32
    intermediate_size = 256
    tp = 2

    key = jax.random.PRNGKey(0)
    kx, kg, ku, kd = jax.random.split(key, 4)

    x = jax.random.normal(kx, (batch, seq, hidden_size), dtype=jnp.float32)
    # PyTorch nn.Linear weight convention: [out_features, in_features]
    gate_w = jax.random.normal(kg, (intermediate_size, hidden_size), jnp.float32) * 0.05
    up_w = jax.random.normal(ku, (intermediate_size, hidden_size), jnp.float32) * 0.05
    down_w = jax.random.normal(kd, (hidden_size, intermediate_size), jnp.float32) * 0.05

    ref = llama_mlp_ref(x, gate_w, up_w, down_w)

    # One-time (load-time) weight preparation — hoisted out of the call path.
    wts_f32 = prepare_llama_mlp_weights(gate_w, up_w, down_w)

    # 1) default generation-aware tiling (single reduction step at toy sizes)
    out = jax.block_until_ready(llama_mlp_pallas(x, wts_f32, tp=tp))
    assert out.shape == (batch, seq, hidden_size)
    assert jnp.allclose(out, ref, atol=1e-4, rtol=1e-4), \
        "mismatch vs reference (default tiling)"

    # 2) forced multi-step grid (>=2 token tiles x 2 reduction tiles) to
    #    exercise the parallel axis and the reduction accumulation.
    out2 = jax.block_until_ready(
        llama_mlp_pallas(x, wts_f32, tp=tp, tm_pref=8, ti_pref=128))
    assert jnp.allclose(out2, ref, atol=1e-4, rtol=1e-4), \
        "mismatch vs reference (tiled grid)"

    # 3) bf16 weight fast path (v6e/v7x MXU-friendly; bf16 SiLU, f32 accum),
    #    compared against a precision-matched reference.
    wts_bf16 = prepare_llama_mlp_weights(gate_w, up_w, down_w,
                                         param_dtype=jnp.bfloat16)
    x_bf16 = x.astype(jnp.bfloat16)
    out_bf = jax.block_until_ready(llama_mlp_pallas(x_bf16, wts_bf16, tp=tp))
    ref_bf = llama_mlp_ref_prepared(x_bf16, wts_bf16, act_dtype=jnp.bfloat16)
    assert jnp.allclose(out_bf.astype(jnp.float32), ref_bf.astype(jnp.float32),
                        atol=2e-2, rtol=5e-2), "mismatch vs reference (bf16 path)"

    print("KERNEL_OK")
</pallas_src>

<mosaic_0001>
module attributes {stable_mosaic.version = 11 : i64} {
  func.func @kernel(%arg0: i32, %arg1: i32, %arg2: memref<16x32xf32, #tpu.memory_space<vmem>>, %arg3: memref<32x256xf32, #tpu.memory_space<vmem>>, %arg4: memref<32x256xf32, #tpu.memory_space<vmem>>, %arg5: memref<256x32xf32, #tpu.memory_space<vmem>>, %arg6: memref<16x32xf32, #tpu.memory_space<vmem>>) attributes {dimension_semantics = [#tpu.dimension_semantics<parallel>, #tpu.dimension_semantics<arbitrary>], iteration_bounds = array<i64: 1, 1>, scalar_prefetch = 0 : i64, scratch_operands = 0 : i64, tpu.core_type = #tpu.core_type<tc>, window_params = [{transform_indices = @transform_0, window_bounds = array<i64: 16, 32>}, {transform_indices = @transform_1, window_bounds = array<i64: 32, 256>}, {transform_indices = @transform_2, window_bounds = array<i64: 32, 256>}, {transform_indices = @transform_3, window_bounds = array<i64: 256, 32>}, {transform_indices = @transform_4, window_bounds = array<i64: 16, 32>}]} {
    %c0_i32 = arith.constant 0 : i32
    %0 = arith.cmpi eq, %arg1, %c0_i32 : i32
    %1 = arith.extui %0 : i1 to i32
    %c0_i32_0 = arith.constant 0 : i32
    %2 = arith.cmpi ne, %1, %c0_i32_0 : i32
    scf.if %2 {
      %cst_15 = arith.constant 0.000000e+00 : f32
      %20 = vector.broadcast %cst_15 : f32 to vector<16x32xf32>
      %c0_16 = arith.constant 0 : index
      %c0_17 = arith.constant 0 : index
      %21 = vector.load %arg6[%c0_16, %c0_17] : memref<16x32xf32, #tpu.memory_space<vmem>>, vector<16x32xf32>
      tpu.vector_store %arg6[%c0_16, %c0_17], %20 {strides = array<i32>} : memref<16x32xf32, #tpu.memory_space<vmem>>, vector<16x32xf32>,
    } else {
    }
    %c0 = arith.constant 0 : index
    %c0_1 = arith.constant 0 : index
    %3 = vector.load %arg2[%c0, %c0_1] : memref<16x32xf32, #tpu.memory_space<vmem>>, vector<16x32xf32>
    %c0_2 = arith.constant 0 : index
    %c0_3 = arith.constant 0 : index
    %4 = vector.load %arg3[%c0_2, %c0_3] : memref<32x256xf32, #tpu.memory_space<vmem>>, vector<32x256xf32>
    %cst = arith.constant dense<0.000000e+00> : vector<16x256xf32>
    %5 = tpu.matmul %3, %4, %cst {dimension_numbers = #tpu.dot_dimension_numbers<[1], [0], [0], [1], [0, 0, 1, 1], [], []>} : vector<16x32xf32>, vector<32x256xf32>, vector<16x256xf32> -> vector<16x256xf32>
    %c0_4 = arith.constant 0 : index
    %c0_5 = arith.constant 0 : index
    %6 = vector.load %arg4[%c0_4, %c0_5] : memref<32x256xf32, #tpu.memory_space<vmem>>, vector<32x256xf32>
    %cst_6 = arith.constant dense<0.000000e+00> : vector<16x256xf32>
    %7 = tpu.matmul %3, %6, %cst_6 {dimension_numbers = #tpu.dot_dimension_numbers<[1], [0], [0], [1], [0, 0, 1, 1], [], []>} : vector<16x32xf32>, vector<32x256xf32>, vector<16x256xf32> -> vector<16x256xf32>
    %8 = arith.negf %5 : vector<16x256xf32>
    %9 = math.exp %8 : vector<16x256xf32>
    %cst_7 = arith.constant 1.000000e+00 : f32
    %10 = vector.broadcast %cst_7 : f32 to vector<16x256xf32>
    %11 = arith.addf %10, %9 : vector<16x256xf32>
    %12 = arith.divf %10, %11 : vector<16x256xf32>
    %13 = arith.mulf %5, %12 : vector<16x256xf32>
    %14 = arith.mulf %13, %7 : vector<16x256xf32>
    %c0_8 = arith.constant 0 : index
    %c0_9 = arith.constant 0 : index
    %15 = vector.load %arg6[%c0_8, %c0_9] : memref<16x32xf32, #tpu.memory_space<vmem>>, vector<16x32xf32>
    %c0_10 = arith.constant 0 : index
    %c0_11 = arith.constant 0 : index
    %16 = vector.load %arg5[%c0_10, %c0_11] : memref<256x32xf32, #tpu.memory_space<vmem>>, vector<256x32xf32>
    %cst_12 = arith.constant dense<0.000000e+00> : vector<16x32xf32>
    %17 = tpu.matmul %14, %16, %cst_12 {dimension_numbers = #tpu.dot_dimension_numbers<[1], [0], [0], [1], [0, 0, 1, 1], [], []>} : vector<16x256xf32>, vector<256x32xf32>, vector<16x32xf32> -> vector<16x32xf32>
    %18 = arith.addf %15, %17 : vector<16x32xf32>
    %c0_13 = arith.constant 0 : index
    %c0_14 = arith.constant 0 : index
    %19 = vector.load %arg6[%c0_13, %c0_14] : memref<16x32xf32, #tpu.memory_space<vmem>>, vector<16x32xf32>
    tpu.vector_store %arg6[%c0_13, %c0_14], %18 {strides = array<i32>} : memref<16x32xf32, #tpu.memory_space<vmem>>, vector<16x32xf32>,
    return
  }
  func.func @transform_0(%arg0: i32, %arg1: i32) -> (i32, i32) {
    %c0_i32 = arith.constant 0 : i32
    %c0_i32_0 = arith.constant 0 : i32
    return %arg0, %c0_i32 : i32, i32
  }
  func.func @transform_1(%arg0: i32, %arg1: i32) -> (i32, i32) {
    %c0_i32 = arith.constant 0 : i32
    %c0_i32_0 = arith.constant 0 : i32
    return %c0_i32, %arg1 : i32, i32
  }
  func.func @transform_2(%arg0: i32, %arg1: i32) -> (i32, i32) {
    %c0_i32 = arith.constant 0 : i32
    %c0_i32_0 = arith.constant 0 : i32
    return %c0_i32, %arg1 : i32, i32
  }
  func.func @transform_3(%arg0: i32, %arg1: i32) -> (i32, i32) {
    %c0_i32 = arith.constant 0 : i32
    %c0_i32_0 = arith.constant 0 : i32
    return %arg1, %c0_i32 : i32, i32
  }
  func.func @transform_4(%arg0: i32, %arg1: i32) -> (i32, i32) {
    %c0_i32 = arith.constant 0 : i32
    %c0_i32_0 = arith.constant 0 : i32
    return %arg0, %c0_i32 : i32, i32
  }
}

</mosaic_0001>

<bundles_post_ra>
// kernel: tpu_custom_call.1
= control target key start
LH: loop header
LB: loop body
LE: loop exit
PB: predicated region body
PF: predicated region fallthrough
CT: control target
= control target key end

     0   :  { %vm22_vm0 = vcmask 261120   ;;  %v503_v7 = vmov 0.0   ;;  %s702_s0 = inlined_call_operand.vmem [shape: f32[16,32], index: 0, kind: input, shape index: {}]   ;;  %s703_s1 = inlined_call_operand.vmem [shape: f32[32,256], index: 1, kind: input, shape index: {}]   ;;  %s704_s2 = inlined_call_operand.vmem [shape: f32[32,256], index: 2, kind: input, shape index: {}]   ;;  %s705_s3 = inlined_call_operand.vmem [shape: f32[256,32], index: 3, kind: input, shape index: {}]   ;;  %s706_s4 = inlined_call_operand.hbm [shape: f32[16,32], index: 4, kind: output, shape index: {}]  }
   0x1   :  { %v28_v0 = vld [vmem:[%s703_s1 + $0x8] sm:$0xff]  ;;  %v30_v1 = vld [vmem:[%s703_s1 + $0x18] sm:$0xff]  ;;  %v27_v2 = vld [vmem:[%s703_s1] sm:$0xff]  ;;  %106 = vmatprep.mubr.f32.mxu1 %v503_v7  ;;  %23 = vst.msk [vmem:[#allocation2] sm:$0xff] %vm22_vm0, %v503_v7 }
   0x2   :  { %v411_v3 = vpack.c.bf16 %v30_v1, %v28_v0  ;;  %v29_v4 = vld [vmem:[%s703_s1 + $0x10] sm:$0xff]  ;;  %v32_v5 = vld [vmem:[%s703_s1 + $0x28] sm:$0xff]  ;;  %v34_v6 = vld [vmem:[%s703_s1 + $0x38] sm:$0xff]  ;;  %24 = vst.msk [vmem:[#allocation2 + $0x8] sm:$0xff] %vm22_vm0, %v503_v7 }
   0x3   :  { %v413_v8 = vpack.c.bf16 %v29_v4, %v27_v2  ;;  %v415_v9 = vpack.c.bf16 %v34_v6, %v32_v5  ;;  %v31_v10 = vld [vmem:[%s703_s1 + $0x20] sm:$0xff]  ;;  %v33_v11 = vld [vmem:[%s703_s1 + $0x30] sm:$0xff]  ;;  %v120_v12 = vld [vmem:[%s704_s2 + $0x8] sm:$0xff] }
   0x4   :  { %412 = vmatprep.subr.bf16.mxu1 %v411_v3  ;;  %v122_v13 = vld [vmem:[%s704_s2 + $0x18] sm:$0xff]  ;;  %v417_v14 = vpack.c.bf16 %v33_v11, %v31_v10  ;;  %v119_v16 = vld [vmem:[%s704_s2] sm:$0xff]  ;;  %v121_v17 = vld [vmem:[%s704_s2 + $0x10] sm:$0xff] }
   0x5   :  { %414 = vmatpush1.bf16.msra.mxu1 %v413_v8  ;;  %v419_v15 = vpack.c.bf16 %v122_v13, %v120_v12  ;;  %v124_v18 = vld [vmem:[%s704_s2 + $0x28] sm:$0xff]  ;;  %v126_v19 = vld [vmem:[%s704_s2 + $0x38] sm:$0xff] }
   0x6   :  { %416 = vmatprep.subr.bf16.mxu1 %v415_v9 }
   0x7   :  { %9 = vsyncpa [#allocation3], 0  ;;  %v25_v20 = vld [vmem:[%s702_s0] sm:$0xff]  ;;  %v421_v21 = vpack.c.bf16 %v121_v17, %v119_v16  ;;  %v423_v22 = vpack.c.bf16 %v126_v19, %v124_v18  ;;  %v125_v24 = vld [vmem:[%s704_s2 + $0x30] sm:$0xff] }
   0x8   :  { %v123_v23 = vld [vmem:[%s704_s2 + $0x20] sm:$0xff]  ;;  %v26_v25 = vld [vmem:[%s702_s0 + $0x8] sm:$0xff]  ;;  %v256_v33 = vld [vmem:[%s705_s3 + $0x90] sm:$0xff] }
   0x9   :  { %418 = vmatpush1.bf16.msra.mxu1 %v417_v14  ;;  %v425_v26 = vpack.c.bf16 %v125_v24, %v123_v23  ;;  %v254_v27 = vld [vmem:[%s705_s3 + $0x80] sm:$0xff]  ;;  %v255_v28 = vld [vmem:[%s705_s3 + $0x88] sm:$0xff]  ;;  %v257_v34 = vld [vmem:[%s705_s3 + $0x98] sm:$0xff] }
   0xa   :  { %420 = vmatprep.subr.bf16.mxu1 %v419_v15  ;;  %v427_v29 = vpack.c.bf16 %v255_v28, %v254_v27  ;;  %v238_v30 = vld [vmem:[%s705_s3] sm:$0xff]  ;;  %v239_v31 = vld [vmem:[%s705_s3 + $0x8] sm:$0xff]  ;;  %v431_v35 = vpack.c.bf16 %v257_v34, %v256_v33  ;;  %v240_v36 = vld [vmem:[%s705_s3 + $0x10] sm:$0xff] }
   0xb   :  { %v429_v32 = vpack.c.bf16 %v239_v31, %v238_v30  ;;  %v241_v37 = vld [vmem:[%s705_s3 + $0x18] sm:$0xff]  ;;  %v258_v39 = vld [vmem:[%s705_s3 + $0xa0] sm:$0xff]  ;;  %v259_v40 = vld [vmem:[%s705_s3 + $0xa8] sm:$0xff] }
   0xc   :  { %365 = vmatmul.mubr.msk.f32.vlgmr.msra.gmra.mrb[0].mxu1 %vm22_vm0, %v25_v20  ;;  %428 = vmatprep.subr.bf16.mxu0 %v427_v29  ;;  %v433_v38 = vpack.c.bf16 %v241_v37, %v240_v36  ;;  %v435_v41 = vpack.c.bf16 %v259_v40, %v258_v39  ;;  %v242_v42 = vld [vmem:[%s705_s3 + $0x20] sm:$0xff]  ;;  %v243_v43 = vld [vmem:[%s705_s3 + $0x28] sm:$0xff]  ;;  %v260_v45 = vld [vmem:[%s705_s3 + $0xb0] sm:$0xff] }
   0xd   :  { %112 = vmatprep.mubr.f32.mxu1 %v503_v7  ;;  %422 = vmatpush1.bf16.msra.mxu1 %v421_v21  ;;  %v437_v44 = vpack.c.bf16 %v243_v43, %v242_v42  ;;  %v261_v46 = vld [vmem:[%s705_s3 + $0xb8] sm:$0xff]  ;;  %v244_v48 = vld [vmem:[%s705_s3 + $0x30] sm:$0xff]  ;;  %v262_v51 = vld [vmem:[%s705_s3 + $0xc0] sm:$0xff] }
   0xe   :  { %424 = vmatprep.subr.bf16.mxu1 %v423_v22  ;;  %430 = vmatpush3.bf16.msra.mxu0 %v429_v32  ;;  %v439_v47 = vpack.c.bf16 %v261_v46, %v260_v45  ;;  %v245_v49 = vld [vmem:[%s705_s3 + $0x38] sm:$0xff]  ;;  %v263_v52 = vld [vmem:[%s705_s3 + $0xc8] sm:$0xff]  ;;  %v246_v54 = vld [vmem:[%s705_s3 + $0x40] sm:$0xff] }
   0xf   :  { %432 = vmatprep.subr.bf16.mxu0 %v431_v35  ;;  %v441_v50 = vpack.c.bf16 %v245_v49, %v244_v48  ;;  %v443_v53 = vpack.c.bf16 %v263_v52, %v262_v51  ;;  %v247_v55 = vld [vmem:[%s705_s3 + $0x48] sm:$0xff]  ;;  %v264_v57 = vld [vmem:[%s705_s3 + $0xd0] sm:$0xff]  ;;  %v265_v58 = vld [vmem:[%s705_s3 + $0xd8] sm:$0xff] }
  0x10   :  { %366 = vmatmul.mubr.msk.f32.gmra.mrb[2].mxu1 %vm22_vm0, %v26_v25  ;;  %v445_v56 = vpack.c.bf16 %v247_v55, %v246_v54  ;;  %v447_v59 = vpack.c.bf16 %v265_v58, %v264_v57  ;;  %v248_v60 = vld [vmem:[%s705_s3 + $0x50] sm:$0xff]  ;;  %v249_v61 = vld [vmem:[%s705_s3 + $0x58] sm:$0xff]  ;;  %v266_v63 = vld [vmem:[%s705_s3 + $0xe0] sm:$0xff] }
  0x11   :  { %426 = vmatpush1.bf16.msra.mxu1 %v425_v26  ;;  %191 = vmatprep.mubr.f32.mxu1 %v503_v7  ;;  %v449_v62 = vpack.c.bf16 %v249_v61, %v248_v60  ;;  %v267_v0 = vld [vmem:[%s705_s3 + $0xe8] sm:$0xff]  ;;  %v250_v2 = vld [vmem:[%s705_s3 + $0x60] sm:$0xff]  ;;  %v268_v5 = vld [vmem:[%s705_s3 + $0xf0] sm:$0xff] }
  0x12   :  { %434 = vmatpush3.bf16.msra.mxu0 %v433_v38  ;;  %v451_v1 = vpack.c.bf16 %v267_v0, %v266_v63  ;;  %v251_v3 = vld [vmem:[%s705_s3 + $0x68] sm:$0xff]  ;;  %v269_v6 = vld [vmem:[%s705_s3 + $0xf8] sm:$0xff]  ;;  %v252_v8 = vld [vmem:[%s705_s3 + $0x70] sm:$0xff] }
  0x13   :  { %436 = vmatprep.subr.bf16.mxu0 %v435_v41  ;;  %v453_v4 = vpack.c.bf16 %v251_v3, %v250_v2  ;;  %v253_v9 = vld [vmem:[%s705_s3 + $0x78] sm:$0xff]  ;;  %s504_s3 = smov [#allocation2]   ;;  %v237_v49 = vld [vmem:[#allocation2 + $0x8] sm:$0xff] }
  0x14   :  { %367 = vmatmul.mubr.msk.f32.vlgmr.msra.gmra.mrb[4].mxu1 %vm22_vm0, %v25_v20  ;;  %v457_v10 = vpack.c.bf16 %v253_v9, %v252_v8  ;;  %s354_s28 = sshll.u32 %s504_s3, 4  ;;  %s355_s28 = int_to_ptr.vmem [resolvable:$true] %s354_s28 }
  0x15   :  { %197 = vmatprep.mubr.f32.mxu1 %v503_v7  ;;  %v455_v7 = vpack.c.bf16 %v269_v6, %v268_v5  ;;  %s479_s29 = scalar_lea.vmem %s355_s28, 256  ;;  %p484_p1 = scmp.lt.s32.totalorder %s355_s28, %s355_s28 }
  0x16   :  { %438 = vmatpush3.bf16.msra.mxu0 %v437_v44  ;;  %v236_v44 = vld [vmem:[#allocation2] sm:$0xff]  ;;  %p480_p0 = scmp.ne.s32.totalorder %s355_s28, %s479_s29  ;;  %p485_p2 = scmp.lt.s32.totalorder %s479_s29, %s479_s29 }
  0x17   :  { %440 = vmatprep.subr.bf16.mxu0 %v439_v47 }
  0x18   :  { %368 = vmatmul.mubr.msk.f32.gmra.mrb[6].mxu1 %vm22_vm0, %v26_v25  ;;  %p486_p3 = por %p485_p2, %p484_p1 }
  0x1a   :  { %442 = vmatpush3.bf16.msra.mxu0 %v441_v50  ;;  %p487_p4 = pnand %p486_p3, %p480_p0 }
  0x1b   :  { %444 = vmatprep.subr.bf16.mxu0 %v443_v53 }
  0x1e   :  { %446 = vmatpush3.bf16.msra.mxu0 %v445_v56 }
  0x1f   :  { %448 = vmatprep.subr.bf16.mxu0 %v447_v59 }
  0x22   :  { %450 = vmatpush3.bf16.msra.mxu0 %v449_v62 }
  0x23   :  { %452 = vmatprep.subr.bf16.mxu0 %v451_v1 }
  0x26   :  { %454 = vmatpush3.bf16.msra.mxu0 %v453_v4 }
  0x27   :  { %456 = vmatprep.subr.bf16.mxu0 %v455_v7 }
  0x2a   :  { %458 = vmatpush3.bf16.msra.mxu0 %v457_v10 }
  0xdf   :  { %v108_v11 = vpop.f32.mrb[0].mxu1 }
  0xe0   :  { %v369_v12 = vmul.f32 -1.442695, %v108_v11  ;;  %v110_v13 = vpop.f32.mrb[1].mxu1 }
  0xe1   :  { %v370_v14 = vmul.f32 -1.442695, %v110_v13 }
  0xe2   :  { %463 = vpow2.f32 %v369_v12 }
  0xe3   :  { %465 = vpow2.f32 %v370_v14  ;;  %v114_v15 = vpop.f32.mrb[2].mxu1 }
  0xe4   :  { %v371_v16 = vmul.f32 -1.442695, %v114_v15  ;;  %v116_v17 = vpop.f32.mrb[3].mxu1 }
  0xe5   :  { %v372_v18 = vmul.f32 -1.442695, %v116_v17 }
  0xe6   :  { %467 = vpow2.f32 %v371_v16 }
  0xe7   :  { %469 = vpow2.f32 %v372_v18  ;;  %v193_v19 = vpop.f32.mrb[4].mxu1 }
  0xe8   :  { %v195_v20 = vpop.f32.mrb[5].mxu1 }
  0xeb   :  { %v199_v21 = vpop.f32.mrb[6].mxu1 }
  0xec   :  { %v464_v22 = vpop.eup %463  ;;  %v201_v23 = vpop.f32.mrb[7].mxu1 }
  0xed   :  { %v466_v24 = vpop.eup %465  ;;  %v216_v25 = vadd.f32 1.0, %v464_v22 }
  0xee   :  { %v217_v26 = vadd.f32 1.0, %v466_v24 }
  0xef   :  { %471 = vrcp.f32 %v216_v25 }
  0xf0   :  { %v468_v27 = vpop.eup %467  ;;  %473 = vrcp.f32 %v217_v26 }
  0xf1   :  { %v470_v28 = vpop.eup %469  ;;  %v218_v29 = vadd.f32 1.0, %v468_v27 }
  0xf2   :  { %v219_v30 = vadd.f32 1.0, %v470_v28 }
  0xf3   :  { %475 = vrcp.f32 %v218_v29 }
  0xf4   :  { %477 = vrcp.f32 %v219_v30 }
  0xf9   :  { %v472_v31 = vpop.eup %471 }
  0xfa   :  { %v474_v32 = vpop.eup %473  ;;  %v228_v33 = vmul.f32 %v472_v31, %v108_v11 }
  0xfb   :  { %v229_v34 = vmul.f32 %v474_v32, %v110_v13 }
  0xfc   :  { %v232_v35 = vmul.f32 %v228_v33, %v193_v19 }
  0xfd   :  { %v476_v36 = vpop.eup %475  ;;  %v233_v37 = vmul.f32 %v229_v34, %v195_v20 }
  0xfe   :  { %v478_v38 = vpop.eup %477  ;;  %v230_v39 = vmul.f32 %v476_v36, %v114_v15 }
  0xff   :  { %v231_v40 = vmul.f32 %v478_v38, %v116_v17  ;;  %334 = vmatprep.mubr.f32.mxu0 %v233_v37 }
 0x100   :  { %v234_v41 = vmul.f32 %v230_v39, %v199_v21  ;;  %335 = vmatmul.mubr.f32.vlgmr.msra.gmra.mrb[0].mxu0 %v232_v35 }
 0x101   :  { %v235_v42 = vmul.f32 %v231_v40, %v201_v23 }
 0x103   :  { %339 = vmatprep.mubr.f32.mxu0 %v235_v42 }
 0x104   :  { %340 = vmatmul.mubr.f32.gmra.mrb[2].mxu0 %v234_v41 }
 0x1d3   :  { %v405_v43 = vpop.f32.mrb[0].mxu0 }
 0x1d4   :  { %v406_v45 = vpop.f32.mrb[1].mxu0 }
 0x1d5   :  { %v407_v46 = vadd.f32 %v406_v45, %v405_v43 }
 0x1d7   :  { %v345_v47 = vadd.f32 %v407_v46, %v236_v44  ;;  %v408_v48 = vpop.f32.mrb[2].mxu0 }
 0x1d8   :  { %v409_v50 = vpop.f32.mrb[3].mxu0 }
 0x1d9   :  { %347 = vst.msk [vmem:[#allocation2] sm:$0xff] %vm22_vm0, %v345_v47  ;;  %v410_v51 = vadd.f32 %v409_v50, %v408_v48 }
 0x1db   :  { %v346_v52 = vadd.f32 %v410_v51, %v237_v49 }
 0x1dd   :  { %348 = vst.msk [vmem:[#allocation2 + $0x8] sm:$0xff] %vm22_vm0, %v346_v52 }
 0x1de   :  { %490 = shalt.err (!%p487_p4)
}
 0x1df   :  { %s491_s6 = scalar_lea.hbm %s706_s4, 256 }
 0x1e0   :  { %p492_p5 = scmp.ne.s32.totalorder %s706_s4, %s491_s6  ;;  %p495_p6 = scmp.lt.u32.totalorder %s491_s6, %s706_s4 }
 0x1e2   :  { %p497_p7 = pnand %p495_p6, %p492_p5 }
 0x1e4   :  { %500 = shalt.err (!%p497_p7)
}
 0x1e5   :  { %s505_s11 = smov 128   ;;  %s506_s12 = smov 8  }
 0x1e6   :  { %360 = dma.vmem_to_hbm [thread:$0]  %s355_s28, 256, %s706_s4, [#allocation3], %s505_s11, %s505_s11, %s506_s12  }
 0x1e7   :  { %501 = dma.done.wait [#allocation3], 256  }
 0x1e8   :  { %502 = vsyncadd [#allocation3], 4294967040 }
 0x1e9   :  { %364 = vsyncpa [#allocation3], 1 }

</bundles_post_ra>
